<compile_context>
chip_gen: v5e
topology: v5e:2x2
jax: 0.10.0
libtpu: 0.0.40
codegen_flags: <defaults>
</compile_context>

<pallas_src>
import functools
import math

import jax
import jax.numpy as jnp
from jax import lax
from jax.experimental import pallas as pl
from jax.experimental.pallas import tpu as pltpu


def _round_up(x: int, m: int) -> int:
    return ((x + m - 1) // m) * m


def _sublane_multiple(*dtypes) -> int:
    """Minimum second-minor tile multiple: 8 (f32), 16 (bf16), 32 (int8/fp8)."""
    m = 8
    for dt in dtypes:
        m = max(m, 32 // max(jnp.dtype(dt).itemsize, 1))
    return m


def _eq_linear_kernel_f32out(x_ref, w_ref, b_ref, o_ref, *, scale: float):
    """f32 output: accumulate straight into the resident output tile (no scratch)."""
    k = pl.program_id(2)

    @pl.when(k == 0)
    def _init():
        o_ref[...] = jnp.zeros_like(o_ref)

    # x: (tm, tk), w: (tn, tk)  ->  contract the IN dim of both (x @ w.T), f32 acc.
    o_ref[...] += lax.dot_general(
        x_ref[...], w_ref[...],
        dimension_numbers=(((1,), (1,)), ((), ())),
        preferred_element_type=jnp.float32)

    @pl.when(k == pl.num_programs(2) - 1)
    def _finalize():
        # Equalized-LR scale + bias applied once on the f32 accumulator.
        o_ref[...] = o_ref[...] * scale + b_ref[...].astype(jnp.float32)


def _eq_linear_kernel_scratch(x_ref, w_ref, b_ref, o_ref, acc_ref, *, scale: float):
    """Narrow output dtypes: f32 VMEM scratch accumulator, cast once in the epilogue."""
    k = pl.program_id(2)

    @pl.when(k == 0)
    def _init():
        acc_ref[...] = jnp.zeros_like(acc_ref)

    acc_ref[...] += lax.dot_general(
        x_ref[...], w_ref[...],
        dimension_numbers=(((1,), (1,)), ((), ())),
        preferred_element_type=jnp.float32)

    @pl.when(k == pl.num_programs(2) - 1)
    def _finalize():
        y = acc_ref[...] * scale + b_ref[...].astype(jnp.float32)
        o_ref[...] = y.astype(o_ref.dtype)


def equalized_linear(x, weight, bias, *, tm=512, tn=None, tk=1024):
    """x: [B, IN], weight: [OUT, IN] (PyTorch layout), bias: [OUT] -> [B, OUT]."""
    B, IN = x.shape
    OUT, IN_w = weight.shape
    assert IN == IN_w, (IN, IN_w)
    assert bias.shape == (OUT,)

    scale = 1.0 / math.sqrt(IN)          # static at trace time -> baked into the kernel
    out_dtype = x.dtype

    # Small-problem fast path: a Pallas launch here is pure fixed overhead; XLA fuses it.
    if 2 * B * IN * OUT < (1 << 20):
        return ((jnp.dot(x, weight.T) * scale) + bias.astype(x.dtype)).astype(out_dtype)

    try:
        vmem_cap = int(pltpu.get_tpu_info().vmem_capacity_bytes)
    except Exception:
        vmem_cap = 64 * 1024 * 1024      # conservative (v7x per-TC) fallback

    if tn is None:
        # 128-MiB VMEM parts (v5e/v6e) can afford a wider output tile; v7x stays at 1024.
        tn = 2048 if vmem_cap >= (100 << 20) else 1024

    sub = _sublane_multiple(x.dtype, out_dtype)

    # Clamp tiles to the padded problem: tm multiple of `sub`, tn/tk multiples of 128.
    tm = min(tm, _round_up(B, sub))
    tn = min(tn, _round_up(OUT, 128))
    tk = min(tk, _round_up(IN, 128))

    # Guarantee >= 2 parallel (i, j) blocks when the shape allows it (keeps v7x's
    # second TensorCore busy); prefer splitting the batch axis.
    def _par_blocks(tm_, tn_):
        return (_round_up(B, tm_) // tm_) * (_round_up(OUT, tn_) // tn_)

    while _par_blocks(tm, tn) < 2:
        new_tm = _round_up(max(tm // 2, sub), sub)
        new_tn = _round_up(max(tn // 2, 128), 128)
        if new_tm < tm and _round_up(B, new_tm) // new_tm >= 2:
            tm = new_tm
        elif new_tn < tn and _round_up(OUT, new_tn) // new_tn >= 2:
            tn = new_tn
        else:
            break

    Bp = _round_up(B, tm)
    OUTp = _round_up(OUT, tn)
    INp = _round_up(IN, tk)

    # Pad only when needed.  Weight is NOT transposed (kernel contracts on its last dim),
    # so the aligned case streams parameters straight from their original HBM layout.
    x_p = x if (Bp == B and INp == IN) else jnp.pad(x, ((0, Bp - B), (0, INp - IN)))
    w_p = weight if (OUTp == OUT and INp == IN) else jnp.pad(
        weight, ((0, OUTp - OUT), (0, INp - IN)))
    b_p = bias.reshape(1, OUT) if OUTp == OUT else jnp.pad(
        bias, (0, OUTp - OUT)).reshape(1, OUTp)

    grid = (Bp // tm, OUTp // tn, INp // tk)

    out_is_f32 = jnp.dtype(out_dtype) == jnp.float32
    dx = jnp.dtype(x.dtype).itemsize
    dw = jnp.dtype(weight.dtype).itemsize
    db = jnp.dtype(bias.dtype).itemsize
    do = jnp.dtype(out_dtype).itemsize

    if out_is_f32:
        kernel = functools.partial(_eq_linear_kernel_f32out, scale=scale)
        scratch_shapes = []
        acc_bytes = 0
    else:
        kernel = functools.partial(_eq_linear_kernel_scratch, scale=scale)
        scratch_shapes = [pltpu.VMEM((tm, tn), jnp.float32)]
        acc_bytes = tm * tn * 4

    # Double-buffered x / w / out / bias tiles (+ optional f32 accumulator), with headroom,
    # capped at ~85% of this generation's physical VMEM.
    vmem_bytes = (2 * tm * tk * dx + 2 * tn * tk * dw + 2 * tm * tn * do
                  + 2 * tn * db + acc_bytes)
    vmem_limit = int(min(max(int(1.5 * vmem_bytes), 32 * 1024 * 1024),
                         int(0.85 * vmem_cap)))

    y_p = pl.pallas_call(
        kernel,
        out_shape=jax.ShapeDtypeStruct((Bp, OUTp), out_dtype),
        grid_spec=pltpu.PrefetchScalarGridSpec(
            num_scalar_prefetch=0,
            grid=grid,
            in_specs=[
                pl.BlockSpec((tm, tk), lambda i, j, k: (i, k)),   # x tile   [B, IN]
                pl.BlockSpec((tn, tk), lambda i, j, k: (j, k)),   # w tile   [OUT, IN]
                pl.BlockSpec((1, tn), lambda i, j, k: (0, j)),    # bias tile
            ],
            out_specs=pl.BlockSpec((tm, tn), lambda i, j, k: (i, j)),
            scratch_shapes=scratch_shapes,
        ),
        compiler_params=pltpu.CompilerParams(
            dimension_semantics=("parallel", "parallel", "arbitrary"),
            vmem_limit_bytes=vmem_limit,
        ),
        cost_estimate=pl.CostEstimate(
            flops=2 * B * IN * OUT,
            transcendentals=0,
            bytes_accessed=B * IN * dx + OUT * IN * dw + OUT * db + B * OUT * do,
        ),
    )(x_p, w_p, b_p)

    if Bp != B or OUTp != OUT:
        y_p = y_p[:B, :OUT]
    return y_p


if __name__ == "__main__":
    key = jax.random.PRNGKey(0)
    kx1, kw1, kb1, kx2, kw2, kb2, kx3, kw3, kb3 = jax.random.split(key, 9)

    def ref_fn(x, w, b):
        return (x @ w.T) * (1.0 / math.sqrt(x.shape[1])) + b

    # Case 1: tile-aligned shapes -> Pallas path (batch axis split so 2 TCs have work),
    # module-default bias scale of 0.0.
    B, IN, OUT = 256, 512, 256
    x = jax.random.normal(kx1, (B, IN), dtype=jnp.float32)
    w = jax.random.normal(kw1, (OUT, IN), dtype=jnp.float32)
    b = jax.random.normal(kb1, (OUT,), dtype=jnp.float32) * 0.0
    y = jax.block_until_ready(equalized_linear(x, w, b))
    assert y.shape == (B, OUT)
    err1 = float(jnp.max(jnp.abs(y - ref_fn(x, w, b))))
    assert err1 < 5e-2, err1   # loose enough for MXU bf16-pass f32 precision differences

    # Case 2: unaligned shapes + nonzero bias -> Pallas path exercising the padding logic.
    B2, IN2, OUT2 = 200, 384, 320
    x2 = jax.random.normal(kx2, (B2, IN2), dtype=jnp.float32)
    w2 = jax.random.normal(kw2, (OUT2, IN2), dtype=jnp.float32)
    b2 = jax.random.normal(kb2, (OUT2,), dtype=jnp.float32) * 0.5
    y2 = jax.block_until_ready(equalized_linear(x2, w2, b2))
    assert y2.shape == (B2, OUT2)
    err2 = float(jnp.max(jnp.abs(y2 - ref_fn(x2, w2, b2))))
    assert err2 < 5e-2, err2

    # Case 3: tiny problem (B=8, IN=32, OUT=16) -> XLA fast path, exact semantics.
    B3, IN3, OUT3 = 8, 32, 16
    x3 = jax.random.normal(kx3, (B3, IN3), dtype=jnp.float32)
    w3 = jax.random.normal(kw3, (OUT3, IN3), dtype=jnp.float32)
    b3 = jax.random.normal(kb3, (OUT3,), dtype=jnp.float32) * 0.5
    y3 = jax.block_until_ready(equalized_linear(x3, w3, b3))
    assert y3.shape == (B3, OUT3)
    assert jnp.allclose(y3, ref_fn(x3, w3, b3), atol=1e-5, rtol=1e-5)

    print("KERNEL_OK")
</pallas_src>

<mosaic_0001>
module attributes {stable_mosaic.version = 11 : i64} {
  func.func @_eq_linear_kernel_f32out(%arg0: i32, %arg1: i32, %arg2: i32, %arg3: memref<128x512xf32, #tpu.memory_space<vmem>>, %arg4: memref<256x512xf32, #tpu.memory_space<vmem>>, %arg5: memref<1x256xf32, #tpu.memory_space<vmem>>, %arg6: memref<128x256xf32, #tpu.memory_space<vmem>>) attributes {dimension_semantics = [#tpu.dimension_semantics<parallel>, #tpu.dimension_semantics<parallel>, #tpu.dimension_semantics<arbitrary>], iteration_bounds = array<i64: 2, 1, 1>, scalar_prefetch = 0 : i64, scratch_operands = 0 : i64, tpu.core_type = #tpu.core_type<tc>, window_params = [{transform_indices = @transform_0, window_bounds = array<i64: 128, 512>}, {transform_indices = @transform_1, window_bounds = array<i64: 256, 512>}, {transform_indices = @transform_2, window_bounds = array<i64: 1, 256>}, {transform_indices = @transform_3, window_bounds = array<i64: 128, 256>}]} {
    %c0_i32 = arith.constant 0 : i32
    %0 = arith.cmpi eq, %arg2, %c0_i32 : i32
    %1 = arith.extui %0 : i1 to i32
    %c0_i32_0 = arith.constant 0 : i32
    %2 = arith.cmpi ne, %1, %c0_i32_0 : i32
    scf.if %2 {
      %cst_10 = arith.constant 0.000000e+00 : f32
      %12 = vector.broadcast %cst_10 : f32 to vector<128x256xf32>
      %c0_11 = arith.constant 0 : index
      %c0_12 = arith.constant 0 : index
      %13 = vector.load %arg6[%c0_11, %c0_12] : memref<128x256xf32, #tpu.memory_space<vmem>>, vector<128x256xf32>
      tpu.vector_store %arg6[%c0_11, %c0_12], %12 {strides = array<i32>} : memref<128x256xf32, #tpu.memory_space<vmem>>, vector<128x256xf32>,
    } else {
    }
    %c0 = arith.constant 0 : index
    %c0_1 = arith.constant 0 : index
    %3 = vector.load %arg6[%c0, %c0_1] : memref<128x256xf32, #tpu.memory_space<vmem>>, vector<128x256xf32>
    %c0_2 = arith.constant 0 : index
    %c0_3 = arith.constant 0 : index
    %4 = vector.load %arg3[%c0_2, %c0_3] : memref<128x512xf32, #tpu.memory_space<vmem>>, vector<128x512xf32>
    %c0_4 = arith.constant 0 : index
    %c0_5 = arith.constant 0 : index
    %5 = vector.load %arg4[%c0_4, %c0_5] : memref<256x512xf32, #tpu.memory_space<vmem>>, vector<256x512xf32>
    %cst = arith.constant dense<0.000000e+00> : vector<128x256xf32>
    %6 = tpu.matmul %4, %5, %cst {dimension_numbers = #tpu.dot_dimension_numbers<[1], [1], [0], [0], [0, 0, 1, 0], [], []>} : vector<128x512xf32>, vector<256x512xf32>, vector<128x256xf32> -> vector<128x256xf32>
    %7 = arith.addf %3, %6 : vector<128x256xf32>
    %c0_6 = arith.constant 0 : index
    %c0_7 = arith.constant 0 : index
    %8 = vector.load %arg6[%c0_6, %c0_7] : memref<128x256xf32, #tpu.memory_space<vmem>>, vector<128x256xf32>
    tpu.vector_store %arg6[%c0_6, %c0_7], %7 {strides = array<i32>} : memref<128x256xf32, #tpu.memory_space<vmem>>, vector<128x256xf32>,
    %c0_i32_8 = arith.constant 0 : i32
    %9 = arith.cmpi eq, %arg2, %c0_i32_8 : i32
    %10 = arith.extui %9 : i1 to i32
    %c0_i32_9 = arith.constant 0 : i32
    %11 = arith.cmpi ne, %10, %c0_i32_9 : i32
    scf.if %11 {
      %c0_10 = arith.constant 0 : index
      %c0_11 = arith.constant 0 : index
      %12 = vector.load %arg6[%c0_10, %c0_11] : memref<128x256xf32, #tpu.memory_space<vmem>>, vector<128x256xf32>
      %cst_12 = arith.constant 0.0441941731 : f32
      %13 = vector.broadcast %cst_12 : f32 to vector<128x256xf32>
      %14 = arith.mulf %12, %13 : vector<128x256xf32>
      %c0_13 = arith.constant 0 : index
      %c0_14 = arith.constant 0 : index
      %15 = vector.load %arg5[%c0_13, %c0_14] : memref<1x256xf32, #tpu.memory_space<vmem>>, vector<1x256xf32>
      %16 = vector.broadcast %15 : vector<1x256xf32> to vector<128x256xf32>
      %17 = arith.addf %14, %16 : vector<128x256xf32>
      %c0_15 = arith.constant 0 : index
      %c0_16 = arith.constant 0 : index
      %18 = vector.load %arg6[%c0_15, %c0_16] : memref<128x256xf32, #tpu.memory_space<vmem>>, vector<128x256xf32>
      tpu.vector_store %arg6[%c0_15, %c0_16], %17 {strides = array<i32>} : memref<128x256xf32, #tpu.memory_space<vmem>>, vector<128x256xf32>,
    } else {
    }
    return
  }
  func.func @transform_0(%arg0: i32, %arg1: i32, %arg2: i32) -> (i32, i32) {
    %c0_i32 = arith.constant 0 : i32
    return %arg0, %arg2 : i32, i32
  }
  func.func @transform_1(%arg0: i32, %arg1: i32, %arg2: i32) -> (i32, i32) {
    %c0_i32 = arith.constant 0 : i32
    return %arg1, %arg2 : i32, i32
  }
  func.func @transform_2(%arg0: i32, %arg1: i32, %arg2: i32) -> (i32, i32) {
    %c0_i32 = arith.constant 0 : i32
    %c0_i32_0 = arith.constant 0 : i32
    return %c0_i32, %arg1 : i32, i32
  }
  func.func @transform_3(%arg0: i32, %arg1: i32, %arg2: i32) -> (i32, i32) {
    %c0_i32 = arith.constant 0 : i32
    return %arg0, %arg1 : i32, i32
  }
}

</mosaic_0001>

<bundles_post_ra>
// kernel: tpu_custom_call.1
= control target key start
LH: loop header
LB: loop body
LE: loop exit
PB: predicated region body
PF: predicated region fallthrough
CT: control target
= control target key end

     0   :  { %8 = vsyncpa [#allocation3], 0  ;;  %s2254_s0 = inlined_call_operand.hbm [shape: f32[256,512], index: 0, kind: input, shape index: {}]   ;;  %s2255_s1 = inlined_call_operand.hbm [shape: f32[256,512], index: 1, kind: input, shape index: {}]   ;;  %s2256_s2 = inlined_call_operand.hbm [shape: f32[1,256], index: 2, kind: input, shape index: {}]   ;;  %s2257_s3 = inlined_call_operand.hbm [shape: f32[256,256], index: 3, kind: output, shape index: {}]  }
   0x1   :  { %10 = vsyncpa [#allocation3 + $0x1], 0 }
   0x2   :  { %11 = vsyncpa [#allocation6], 0 }
   0x3   :  { %12 = vsyncpa [#allocation4], 0 }
   0x4   :  { %14 = vsyncpa [#allocation4 + $0x1], 0  ;;  %s1708_s12 = smov 0   ;;  %s1710_s13 = smov 0  }
   0x5   :  { %s1712_s14 = smov 0   ;;  %s1714_s15 = smov 0  }
   0x6   :  { %s1716_s16 = smov 0   ;;  %s1718_s17 = smov 0  }
   0x7 LB: > { %s1391_s18 = sadd.s32 4294967295, %s1680_s17   ;;  %s1392_s19 = sadd.s32 4294967294, %s1680_s17   ;;  %s1680_s17 = sphi %s1718_s17, %s20_s17   ;;  %s1676_s16 = sphi %s1716_s16, %s2300_s16   ;;  %s1672_s15 = sphi %s1714_s15, %s2299_s15   ;;  %s1668_s14 = sphi %s1712_s14, %s2298_s14   ;;  %s1664_s13 = sphi %s1710_s13, %s2297_s13   ;;  %s1660_s12 = sphi %s1708_s12, %s2296_s12  }
   0x8   : > { %p61_p0 = scmp.ne.s32.totalorder %s1664_s13, %s1660_s12  ;;  %p1742_p1 = scmp.eq.s32.totalorder %s1391_s18, 0 }
   0x9   : > { %p147_p2 = scmp.eq.s32.totalorder %s1392_s19, 1  ;;  %p1393_p4 = scmp.ge.s32.totalorder %s1680_s17, 1 }
   0xa   : > { %p1748_p3 = por %p1742_p1, %p61_p0  ;;  %p154_p6 = scmp.lt.s32.totalorder %s1680_s17, 3 }
   0xb   : > { %p1753_p5 = por %p147_p2, %p61_p0  ;;  %s171_s25 = sshll.u32 %s2255_s1, 4  ;;  %s172_s25 = int_to_ptr.hbm [resolvable:$true] %s171_s25 }
   0xc   : > { %p1761_p7 = pnand %p1393_p4, %p154_p6  ;;  %s1682_s27 = smov [#allocation5]  }
   0xd   : > { %s173_s28 = sshll.u32 %s1682_s27, 4  ;;  %p1396_p10 = scmp.ge.s32.totalorder %s1680_s17, 2  ;;  %s174_s28 = int_to_ptr.vmem [resolvable:$true] %s173_s28 }
   0xe   : > { %p1428_p8 = pneg %p1761_p7  ;;  %s188_s4 = sshll.u32 %s2256_s2, 4  ;;  %s189_s4 = int_to_ptr.hbm [resolvable:$true] %s188_s4 }
   0xf   : > { %s1683_s5 = smov 512   ;;  %s1684_s6 = smov 32  }
  0x10   : > { %p1429_p9 = pnand %p1428_p8, %p1742_p1  ;;  %s1685_s7 = smov [#allocation7]  }
  0x11   : > { %s190_s8 = sshll.u32 %s1685_s7, 4  ;;  %p141_p11 = scmp.eq.s32.totalorder %s1391_s18, 1  ;;  %s191_s8 = int_to_ptr.vmem [resolvable:$true] %s190_s8 }
  0x12   : > { %1431 = dma.hbm_to_vmem [thread:$0]  (!%p1429_p9), %s172_s25, 16384, %s174_s28, [#allocation6], %s1683_s5, %s1683_s5, %s1684_s6  }
  0x13   : > { %1434 = dma.hbm_to_vmem [thread:$0]  (!%p1429_p9), %s189_s4, 32, %s191_s8, [#allocation6]  }
  0x14   : > { %s39_s9 = sadd.s32 1, %s1676_s16  ;;  %s48_s10 = sadd.s32 1, %s1668_s14 }
  0x15   : > { %p41_p12 = scmp.ge.s32.totalorder %s39_s9, 2  ;;  %p55_p13 = scmp.ne.s32.totalorder %s1668_s14, %s1664_s13 }
  0x16   : > { %p56_p0 = scmp.eq.s32.totalorder %s1680_s17, 0  ;;  %p1445_p4 = scmp.lt.s32.totalorder %s1680_s17, 2 }
  0x17   : > { %s2302_s9 = smov (%p41_p12, %s39_s9), 0  ;;  %p1783_p2 = por %p141_p11, %p55_p13 }
  0x18   : > { %s43_s19 = ssub.s32 %s1676_s16, %s2302_s9  ;;  %s201_s23 = sand.u32 1, %s1668_s14  }
  0x19   : > { %p46_p6 = scmp.eq.s32.totalorder %s43_s19, 0  ;;  %p57_p8 = por %p56_p0, %p55_p13 }
  0x1a   : > { %s1397_s24 = sshll.u32 %s201_s23, 9  ;;  %s1413_s18 = sshll.u32 %s1676_s16, 9 }
  0x1b   : > { %s1793_s25 = scalar_select %p46_p6, %s1668_s14, %s48_s10  }
  0x1c   : > { %s213_s29 = scalar_lea.hbm %s2254_s0, %s1413_s18  ;;  %s205_s4 = scalar_lea.vmem [#allocation2], %s1397_s24 }
  0x1d   : > { %s214_s30 = sshll.u32 %s213_s29, 4  ;;  %s216_s7 = sshll.u32 %s205_s4, 4  ;;  %s215_s30 = int_to_ptr.hbm [resolvable:$true] %s214_s30  ;;  %s217_s7 = int_to_ptr.vmem [resolvable:$true] %s216_s7 }
  0x1e   : > { %p1436_p9 = pnand %p1445_p4, %p57_p8  ;;  %s202_s8 = scalar_lea.sflag [#allocation3], %s201_s23 }
  0x1f   : > { %228 = sbr.rel (%p1761_p7) target bundleno = 498 (0x1f2), region = 32 }
  0x20   : > { %1438 = dma.hbm_to_vmem [thread:$0]  (!%p1436_p9), %s215_s30, 8192, %s217_s7, %s202_s8, %s1683_s5, %s1683_s5, %s1684_s6  }
  0x24   : > { %s1806_s10 = sand.u32 1, %s1664_s13  }
  0x25   : > { %s1402_s19 = sshll.u32 %s1806_s10, 9  ;;  %s231_s24 = scalar_lea.sflag [#allocation3], %s1806_s10 }
  0x26   : > { %s1810_s18 = scalar_lea.vmem [#allocation2], %s1402_s19 }
  0x27   : > { %1647 = dma.done.wait (%p1748_p3), %s231_s24, 8192  }
  0x28   : > { %1649 = vsyncadd (%p1748_p3), %s231_s24, 4294959104 }
  0x29   : > { %1651 = dma.done.wait (%p1742_p1), [#allocation6], 16416  }
  0x2a   : > { %1653 = vsyncadd (%p1742_p1), [#allocation6], 4294950880  ;;  %v469_v0 = vld [vmem:[#allocation5 + $0x1f0] sm:$0xff]  ;;  %v470_v1 = vld [vmem:[#allocation5 + $0x1f8] sm:$0xff]  ;;  %s1405_s20 = sshll.u32 %s1806_s10, 8  ;;  %s1415_s26 = sshll.u32 %s1672_s15, 8 }
  0x2b   : > { %v467_v2 = vld [vmem:[#allocation5 + $0x1e0] sm:$0xff]  ;;  %665 = vmatpush.xpose.msra.mxu2 %v469_v0  ;;  %730 = vmatpush.xpose.msra.mxu3 %v470_v1  ;;  %v468_v3 = vld [vmem:[#allocation5 + $0x1e8] sm:$0xff]  ;;  %v465_v4 = vld [vmem:[#allocation5 + $0x1d0] sm:$0xff]  ;;  %s2091_s21 = scalar_lea.vmem [#allocation8], %s1405_s20  ;;  %s1271_s23 = scalar_lea.hbm %s2257_s3, %s1415_s26 }
  0x2c   : > { %535 = vmatpush.xpose.msra.mxu0 %v467_v2  ;;  %600 = vmatpush.xpose.msra.mxu1 %v468_v3  ;;  %v466_v5 = vld [vmem:[#allocation5 + $0x1d8] sm:$0xff]  ;;  %v463_v6 = vld [vmem:[#allocation5 + $0x1c0] sm:$0xff]  ;;  %v464_v7 = vld [vmem:[#allocation5 + $0x1c8] sm:$0xff]  ;;  %s1272_s27 = sshll.u32 %s2091_s21, 4  ;;  %s1274_s28 = sshll.u32 %s1271_s23, 4  ;;  %s1273_s27 = int_to_ptr.vmem [resolvable:$true] %s1272_s27  ;;  %s1275_s28 = int_to_ptr.hbm [resolvable:$true] %s1274_s28 }
  0x2d   : > { %v461_v8 = vld [vmem:[#allocation5 + $0x1b0] sm:$0xff]  ;;  %v462_v9 = vld [vmem:[#allocation5 + $0x1b8] sm:$0xff]  ;;  %v459_v10 = vld [vmem:[#allocation5 + $0x1a0] sm:$0xff]  ;;  %s1257_s15 = scalar_lea.sflag [#allocation4], %s1806_s10  ;;  %s1608_s29 = sshra.s32 %s1275_s28, 4  ;;  %s1609_s29 = int_to_ptr.hbm [resolvable:$true] %s1608_s29 }
  0x2e   : > { %v460_v11 = vld [vmem:[#allocation5 + $0x1a8] sm:$0xff]  ;;  %v457_v12 = vld [vmem:[#allocation5 + $0x190] sm:$0xff]  ;;  %v458_v13 = vld [vmem:[#allocation5 + $0x198] sm:$0xff]  ;;  %s1610_s30 = scalar_lea.hbm %s1609_s29, 256  ;;  %s1614_s8 = scalar_lea.hbm %s2257_s3, 512 }
  0x2f   : > { %666 = vmatpush.xpose.msra.mxu2 %v465_v4  ;;  %731 = vmatpush.xpose.msra.mxu3 %v466_v5  ;;  %v455_v14 = vld [vmem:[#allocation5 + $0x180] sm:$0xff]  ;;  %v456_v15 = vld [vmem:[#allocation5 + $0x188] sm:$0xff]  ;;  %v453_v16 = vld [vmem:[#allocation5 + $0x170] sm:$0xff]  ;;  %p1611_p1 = scmp.ne.s32.totalorder %s1609_s29, %s1610_s30  ;;  %p1615_p11 = scmp.lt.s32.totalorder %s1609_s29, %s2257_s3 }
  0x30   : > { %536 = vmatpush.xpose.msra.mxu0 %v463_v6  ;;  %601 = vmatpush.xpose.msra.mxu1 %v464_v7  ;;  %v454_v17 = vld [vmem:[#allocation5 + $0x178] sm:$0xff]  ;;  %v451_v18 = vld [vmem:[#allocation5 + $0x160] sm:$0xff]  ;;  %v452_v19 = vld [vmem:[#allocation5 + $0x168] sm:$0xff]  ;;  %p1616_p12 = scmp.lt.s32.totalorder %s1614_s8, %s1610_s30 }
  0x31   : > { %v449_v20 = vld [vmem:[#allocation5 + $0x150] sm:$0xff]  ;;  %v450_v21 = vld [vmem:[#allocation5 + $0x158] sm:$0xff]  ;;  %v447_v22 = vld [vmem:[#allocation5 + $0x140] sm:$0xff]  ;;  %p1612_p3 = pnand %p1611_p1, %p1783_p2 }
  0x32   : > { %v448_v23 = vld [vmem:[#allocation5 + $0x148] sm:$0xff]  ;;  %v445_v24 = vld [vmem:[#allocation5 + $0x130] sm:$0xff]  ;;  %v446_v25 = vld [vmem:[#allocation5 + $0x138] sm:$0xff]  ;;  %p1617_p13 = por %p1616_p12, %p1615_p11 }
  0x33   : > { %667 = vmatpush.xpose.msra.mxu2 %v461_v8  ;;  %732 = vmatpush.xpose.msra.mxu3 %v462_v9  ;;  %v443_v26 = vld [vmem:[#allocation5 + $0x120] sm:$0xff]  ;;  %v444_v27 = vld [vmem:[#allocation5 + $0x128] sm:$0xff]  ;;  %v441_v28 = vld [vmem:[#allocation5 + $0x110] sm:$0xff]  ;;  %p1613_p7 = pneg %p1612_p3 }
  0x34   : > { %537 = vmatpush.xpose.msra.mxu0 %v459_v10  ;;  %602 = vmatpush.xpose.msra.mxu1 %v460_v11  ;;  %v442_v29 = vld [vmem:[#allocation5 + $0x118] sm:$0xff]  ;;  %v439_v30 = vld [vmem:[#allocation5 + $0x100] sm:$0xff]  ;;  %v440_v31 = vld [vmem:[#allocation5 + $0x108] sm:$0xff] }
  0x35   : > { %v437_v32 = vld [vmem:[#allocation5 + $0xf0] sm:$0xff]  ;;  %v438_v33 = vld [vmem:[#allocation5 + $0xf8] sm:$0xff]  ;;  %v435_v34 = vld [vmem:[#allocation5 + $0xe0] sm:$0xff]  ;;  %p1618_p0 = pnand %p1617_p13, %p1613_p7 }
  0x36   : > { %v436_v35 = vld [vmem:[#allocation5 + $0xe8] sm:$0xff]  ;;  %v433_v36 = vld [vmem:[#allocation5 + $0xd0] sm:$0xff]  ;;  %v434_v37 = vld [vmem:[#allocation5 + $0xd8] sm:$0xff] }
  0x37   : > { %668 = vmatpush.xpose.msra.mxu2 %v457_v12  ;;  %733 = vmatpush.xpose.msra.mxu3 %v458_v13  ;;  %v431_v38 = vld [vmem:[#allocation5 + $0xc0] sm:$0xff]  ;;  %v432_v39 = vld [vmem:[#allocation5 + $0xc8] sm:$0xff]  ;;  %v429_v40 = vld [vmem:[#allocation5 + $0xb0] sm:$0xff] }
  0x38   : > { %538 = vmatpush.xpose.msra.mxu0 %v455_v14  ;;  %603 = vmatpush.xpose.msra.mxu1 %v456_v15  ;;  %v430_v41 = vld [vmem:[#allocation5 + $0xb8] sm:$0xff]  ;;  %v427_v42 = vld [vmem:[#allocation5 + $0xa0] sm:$0xff]  ;;  %v428_v43 = vld [vmem:[#allocation5 + $0xa8] sm:$0xff] }
  0x39   : > { %v425_v44 = vld [vmem:[#allocation5 + $0x90] sm:$0xff]  ;;  %v426_v45 = vld [vmem:[#allocation5 + $0x98] sm:$0xff]  ;;  %v423_v46 = vld [vmem:[#allocation5 + $0x80] sm:$0xff] }
  0x3a   : > { %v424_v47 = vld [vmem:[#allocation5 + $0x88] sm:$0xff]  ;;  %v421_v48 = vld [vmem:[#allocation5 + $0x70] sm:$0xff]  ;;  %v422_v49 = vld [vmem:[#allocation5 + $0x78] sm:$0xff] }
  0x3b   : > { %669 = vmatpush.xpose.msra.mxu2 %v453_v16  ;;  %734 = vmatpush.xpose.msra.mxu3 %v454_v17  ;;  %v419_v50 = vld [vmem:[#allocation5 + $0x60] sm:$0xff]  ;;  %v420_v51 = vld [vmem:[#allocation5 + $0x68] sm:$0xff]  ;;  %v417_v52 = vld [vmem:[#allocation5 + $0x50] sm:$0xff] }
  0x3c   : > { %539 = vmatpush.xpose.msra.mxu0 %v451_v18  ;;  %604 = vmatpush.xpose.msra.mxu1 %v452_v19  ;;  %v418_v53 = vld [vmem:[#allocation5 + $0x58] sm:$0xff]  ;;  %v415_v54 = vld [vmem:[#allocation5 + $0x40] sm:$0xff]  ;;  %v416_v55 = vld [vmem:[#allocation5 + $0x48] sm:$0xff] }
  0x3d   : > { %v413_v56 = vld [vmem:[#allocation5 + $0x30] sm:$0xff]  ;;  %v414_v57 = vld [vmem:[#allocation5 + $0x38] sm:$0xff]  ;;  %v411_v58 = vld [vmem:[#allocation5 + $0x20] sm:$0xff] }
  0x3e   : > { %v412_v59 = vld [vmem:[#allocation5 + $0x28] sm:$0xff]  ;;  %v409_v60 = vld [vmem:[#allocation5 + $0x10] sm:$0xff]  ;;  %v410_v61 = vld [vmem:[#allocation5 + $0x18] sm:$0xff] }
  0x3f   : > { %670 = vmatpush.xpose.msra.mxu2 %v449_v20  ;;  %735 = vmatpush.xpose.msra.mxu3 %v450_v21  ;;  %v533_v62 = vld [vmem:[#allocation5 + $0x3f0] sm:$0xff]  ;;  %v407_v63 = vld [vmem:[#allocation5] sm:$0xff]  ;;  %v408_v0 = vld [vmem:[#allocation5 + $0x8] sm:$0xff] }
  0x40   : > { %540 = vmatpush.xpose.msra.mxu0 %v447_v22  ;;  %605 = vmatpush.xpose.msra.mxu1 %v448_v23  ;;  %v534_v1 = vld [vmem:[#allocation5 + $0x3f8] sm:$0xff]  ;;  %v1821_v2 = vld [vmem:[%s1810_s18 + $0x10] sm:$0xff]  ;;  %v1827_v4 = vld [vmem:[%s1810_s18] sm:$0xff] }
  0x41   : > { %v1824_v3 = vld [vmem:[%s1810_s18 + $0x18] sm:$0xff]  ;;  %v532_v5 = vld [vmem:[#allocation5 + $0x3e8] sm:$0xff]  ;;  %v531_v7 = vld [vmem:[#allocation5 + $0x3e0] sm:$0xff] }
  0x42   : > { %v1830_v6 = vld [vmem:[%s1810_s18 + $0x8] sm:$0xff]  ;;  %v529_v8 = vld [vmem:[#allocation5 + $0x3d0] sm:$0xff]  ;;  %v530_v9 = vld [vmem:[#allocation5 + $0x3d8] sm:$0xff] }
  0x43   : > { %671 = vmatpush.xpose.msra.mxu2 %v445_v24  ;;  %736 = vmatpush.xpose.msra.mxu3 %v446_v25  ;;  %v528_v10 = vld [vmem:[#allocation5 + $0x3c8] sm:$0xff]  ;;  %v527_v11 = vld [vmem:[#allocation5 + $0x3c0] sm:$0xff]  ;;  %v525_v12 = vld [vmem:[#allocation5 + $0x3b0] sm:$0xff] }
  0x44   : > { %541 = vmatpush.xpose.msra.mxu0 %v443_v26  ;;  %606 = vmatpush.xpose.msra.mxu1 %v444_v27  ;;  %v526_v13 = vld [vmem:[#allocation5 + $0x3b8] sm:$0xff]  ;;  %v1837_v14 = vld [vmem:[%s1810_s18 + $0x30] sm:$0xff]  ;;  %v1843_v16 = vld [vmem:[%s1810_s18 + $0x20] sm:$0xff] }
  0x45   : > { %v1840_v15 = vld [vmem:[%s1810_s18 + $0x38] sm:$0xff]  ;;  %v524_v17 = vld [vmem:[#allocation5 + $0x3a8] sm:$0xff]  ;;  %v523_v19 = vld [vmem:[#allocation5 + $0x3a0] sm:$0xff] }
  0x46   : > { %v1846_v18 = vld [vmem:[%s1810_s18 + $0x28] sm:$0xff]  ;;  %v521_v20 = vld [vmem:[#allocation5 + $0x390] sm:$0xff]  ;;  %v522_v21 = vld [vmem:[#allocation5 + $0x398] sm:$0xff] }
  0x47   : > { %672 = vmatpush.xpose.msra.mxu2 %v441_v28  ;;  %737 = vmatpush.xpose.msra.mxu3 %v442_v29  ;;  %v520_v22 = vld [vmem:[#allocation5 + $0x388] sm:$0xff]  ;;  %v519_v23 = vld [vmem:[#allocation5 + $0x380] sm:$0xff]  ;;  %v517_v24 = vld [vmem:[#allocation5 + $0x370] sm:$0xff] }
  0x48   : > { %542 = vmatpush.xpose.msra.mxu0 %v439_v30  ;;  %607 = vmatpush.xpose.msra.mxu1 %v440_v31  ;;  %v518_v25 = vld [vmem:[#allocation5 + $0x378] sm:$0xff]  ;;  %v1853_v26 = vld [vmem:[%s1810_s18 + $0x50] sm:$0xff]  ;;  %v1859_v28 = vld [vmem:[%s1810_s18 + $0x40] sm:$0xff] }
  0x49   : > { %v1856_v27 = vld [vmem:[%s1810_s18 + $0x58] sm:$0xff]  ;;  %v516_v29 = vld [vmem:[#allocation5 + $0x368] sm:$0xff]  ;;  %v515_v31 = vld [vmem:[#allocation5 + $0x360] sm:$0xff] }
  0x4a   : > { %v1862_v30 = vld [vmem:[%s1810_s18 + $0x48] sm:$0xff] }
  0x4b   : > { %673 = vmatpush.xpose.msra.mxu2 %v437_v32  ;;  %738 = vmatpush.xpose.msra.mxu3 %v438_v33  ;;  %v513_v32 = vld [vmem:[#allocation5 + $0x350] sm:$0xff]  ;;  %v514_v33 = vld [vmem:[#allocation5 + $0x358] sm:$0xff] }
  0x4c   : > { %543 = vmatpush.xpose.msra.mxu0 %v435_v34  ;;  %608 = vmatpush.xpose.msra.mxu1 %v436_v35  ;;  %v512_v34 = vld [vmem:[#allocation5 + $0x348] sm:$0xff]  ;;  %v511_v35 = vld [vmem:[#allocation5 + $0x340] sm:$0xff] }
  0x4f   : > { %674 = vmatpush.xpose.msra.mxu2 %v433_v36  ;;  %739 = vmatpush.xpose.msra.mxu3 %v434_v37  ;;  %v509_v36 = vld [vmem:[#allocation5 + $0x330] sm:$0xff]  ;;  %v510_v37 = vld [vmem:[#allocation5 + $0x338] sm:$0xff] }
  0x50   : > { %544 = vmatpush.xpose.msra.mxu0 %v431_v38  ;;  %609 = vmatpush.xpose.msra.mxu1 %v432_v39  ;;  %v1869_v38 = vld [vmem:[%s1810_s18 + $0x70] sm:$0xff]  ;;  %v1872_v39 = vld [vmem:[%s1810_s18 + $0x78] sm:$0xff] }
  0x53   : > { %675 = vmatpush.xpose.msra.mxu2 %v429_v40  ;;  %740 = vmatpush.xpose.msra.mxu3 %v430_v41  ;;  %v1875_v40 = vld [vmem:[%s1810_s18 + $0x60] sm:$0xff]  ;;  %v508_v41 = vld [vmem:[#allocation5 + $0x328] sm:$0xff] }
  0x54   : > { %545 = vmatpush.xpose.msra.mxu0 %v427_v42  ;;  %610 = vmatpush.xpose.msra.mxu1 %v428_v43  ;;  %v1878_v42 = vld [vmem:[%s1810_s18 + $0x68] sm:$0xff]  ;;  %v507_v43 = vld [vmem:[#allocation5 + $0x320] sm:$0xff] }
  0x57   : > { %676 = vmatpush.xpose.msra.mxu2 %v425_v44  ;;  %741 = vmatpush.xpose.msra.mxu3 %v426_v45  ;;  %v505_v44 = vld [vmem:[#allocation5 + $0x310] sm:$0xff]  ;;  %v506_v45 = vld [vmem:[#allocation5 + $0x318] sm:$0xff] }
  0x58   : > { %546 = vmatpush.xpose.msra.mxu0 %v423_v46  ;;  %611 = vmatpush.xpose.msra.mxu1 %v424_v47  ;;  %v504_v46 = vld [vmem:[#allocation5 + $0x308] sm:$0xff]  ;;  %v503_v47 = vld [vmem:[#allocation5 + $0x300] sm:$0xff] }
  0x5b   : > { %677 = vmatpush.xpose.msra.mxu2 %v421_v48  ;;  %742 = vmatpush.xpose.msra.mxu3 %v422_v49  ;;  %v1885_v48 = vld [vmem:[%s1810_s18 + $0x90] sm:$0xff]  ;;  %v1888_v49 = vld [vmem:[%s1810_s18 + $0x98] sm:$0xff] }
  0x5c   : > { %547 = vmatpush.xpose.msra.mxu0 %v419_v50  ;;  %612 = vmatpush.xpose.msra.mxu1 %v420_v51  ;;  %v1891_v50 = vld [vmem:[%s1810_s18 + $0x80] sm:$0xff]  ;;  %v1894_v51 = vld [vmem:[%s1810_s18 + $0x88] sm:$0xff] }
  0x5f   : > { %678 = vmatpush.xpose.msra.mxu2 %v417_v52  ;;  %743 = vmatpush.xpose.msra.mxu3 %v418_v53  ;;  %v501_v52 = vld [vmem:[#allocation5 + $0x2f0] sm:$0xff]  ;;  %v502_v53 = vld [vmem:[#allocation5 + $0x2f8] sm:$0xff] }
  0x60   : > { %548 = vmatpush.xpose.msra.mxu0 %v415_v54  ;;  %613 = vmatpush.xpose.msra.mxu1 %v416_v55  ;;  %v499_v54 = vld [vmem:[#allocation5 + $0x2e0] sm:$0xff]  ;;  %v500_v55 = vld [vmem:[#allocation5 + $0x2e8] sm:$0xff] }
  0x63   : > { %679 = vmatpush.xpose.msra.mxu2 %v413_v56  ;;  %744 = vmatpush.xpose.msra.mxu3 %v414_v57  ;;  %v1901_v56 = vld [vmem:[%s1810_s18 + $0xb0] sm:$0xff]  ;;  %v1904_v57 = vld [vmem:[%s1810_s18 + $0xb8] sm:$0xff] }
  0x64   : > { %549 = vmatpush.xpose.msra.mxu0 %v411_v58  ;;  %614 = vmatpush.xpose.msra.mxu1 %v412_v59  ;;  %v1907_v58 = vld [vmem:[%s1810_s18 + $0xa0] sm:$0xff]  ;;  %v1910_v59 = vld [vmem:[%s1810_s18 + $0xa8] sm:$0xff] }
  0x67   : > { %680 = vmatpush.xpose.msra.mxu2 %v409_v60  ;;  %745 = vmatpush.xpose.msra.mxu3 %v410_v61  ;;  %v497_v60 = vld [vmem:[#allocation5 + $0x2d0] sm:$0xff]  ;;  %v498_v61 = vld [vmem:[#allocation5 + $0x2d8] sm:$0xff] }
  0x68   : > { %550 = vmatpush.xpose.msra.mxu0 %v407_v63  ;;  %615 = vmatpush.xpose.msra.mxu1 %v408_v0  ;;  %v496_v63 = vld [vmem:[#allocation5 + $0x2c8] sm:$0xff]  ;;  %v1917_v0 = vld [vmem:[%s1810_s18 + $0xd0] sm:$0xff] }
  0x6a   : > { %681 = vmatmul.f32.vlgmr.msra.gmra.mxu2 %v1821_v2  ;;  %746 = vmatmul.f32.vlgmr.msra.gmra.mxu3 %v1824_v3 }
  0x6b   : > { %925 = vmatpush.xpose.msrb.mxu2 %v533_v62  ;;  %990 = vmatpush.xpose.msrb.mxu3 %v534_v1  ;;  %v495_v62 = vld [vmem:[#allocation5 + $0x2c0] sm:$0xff]  ;;  %v1920_v1 = vld [vmem:[%s1810_s18 + $0xd8] sm:$0xff] }
  0x6c   : > { %551 = vmatmul.f32.vlgmr.msra.gmra.mxu0 %v1827_v4  ;;  %860 = vmatpush.xpose.msrb.mxu1 %v532_v5  ;;  %v1923_v5 = vld [vmem:[%s1810_s18 + $0xc0] sm:$0xff] }
  0x6d   : > { %616 = vmatmul.f32.vlgmr.msra.gmra.mxu1 %v1830_v6  ;;  %795 = vmatpush.xpose.msrb.mxu0 %v531_v7  ;;  %v1926_v7 = vld [vmem:[%s1810_s18 + $0xc8] sm:$0xff] }
  0x6f   : > { %926 = vmatpush.xpose.msrb.mxu2 %v529_v8  ;;  %991 = vmatpush.xpose.msrb.mxu3 %v530_v9  ;;  %v493_v8 = vld [vmem:[#allocation5 + $0x2b0] sm:$0xff]  ;;  %v494_v9 = vld [vmem:[#allocation5 + $0x2b8] sm:$0xff] }
  0x70   : > { %861 = vmatpush.xpose.msrb.mxu1 %v528_v10  ;;  %v491_v10 = vld [vmem:[#allocation5 + $0x2a0] sm:$0xff] }
  0x71   : > { %796 = vmatpush.xpose.msrb.mxu0 %v527_v11  ;;  %v492_v11 = vld [vmem:[#allocation5 + $0x2a8] sm:$0xff] }
  0x72   : > { %684 = vmatmul.f32.gmra.mxu2 %v1837_v14  ;;  %749 = vmatmul.f32.gmra.mxu3 %v1840_v15 }
  0x73   : > { %927 = vmatpush.xpose.msrb.mxu2 %v525_v12  ;;  %992 = vmatpush.xpose.msrb.mxu3 %v526_v13  ;;  %v1933_v12 = vld [vmem:[%s1810_s18 + $0xf0] sm:$0xff]  ;;  %v1936_v13 = vld [vmem:[%s1810_s18 + $0xf8] sm:$0xff] }
  0x74   : > { %554 = vmatmul.f32.gmra.mxu0 %v1843_v16  ;;  %862 = vmatpush.xpose.msrb.mxu1 %v524_v17  ;;  %v1939_v17 = vld [vmem:[%s1810_s18 + $0xe0] sm:$0xff] }
  0x75   : > { %619 = vmatmul.f32.gmra.mxu1 %v1846_v18  ;;  %797 = vmatpush.xpose.msrb.mxu0 %v523_v19  ;;  %v1942_v19 = vld [vmem:[%s1810_s18 + $0xe8] sm:$0xff] }
  0x77   : > { %928 = vmatpush.xpose.msrb.mxu2 %v521_v20  ;;  %993 = vmatpush.xpose.msrb.mxu3 %v522_v21  ;;  %v489_v20 = vld [vmem:[#allocation5 + $0x290] sm:$0xff]  ;;  %v490_v21 = vld [vmem:[#allocation5 + $0x298] sm:$0xff] }
  0x78   : > { %863 = vmatpush.xpose.msrb.mxu1 %v520_v22  ;;  %v487_v22 = vld [vmem:[#allocation5 + $0x280] sm:$0xff] }
  0x79   : > { %798 = vmatpush.xpose.msrb.mxu0 %v519_v23  ;;  %v488_v23 = vld [vmem:[#allocation5 + $0x288] sm:$0xff] }
  0x7a   : > { %687 = vmatmul.f32.gmra.mxu2 %v1853_v26  ;;  %752 = vmatmul.f32.gmra.mxu3 %v1856_v27 }
  0x7b   : > { %929 = vmatpush.xpose.msrb.mxu2 %v517_v24  ;;  %994 = vmatpush.xpose.msrb.mxu3 %v518_v25  ;;  %v1949_v24 = vld [vmem:[%s1810_s18 + $0x110] sm:$0xff]  ;;  %v1952_v25 = vld [vmem:[%s1810_s18 + $0x118] sm:$0xff] }
  0x7c   : > { %557 = vmatmul.f32.gmra.mxu0 %v1859_v28  ;;  %864 = vmatpush.xpose.msrb.mxu1 %v516_v29  ;;  %v1955_v29 = vld [vmem:[%s1810_s18 + $0x100] sm:$0xff] }
  0x7d   : > { %622 = vmatmul.f32.gmra.mxu1 %v1862_v30  ;;  %799 = vmatpush.xpose.msrb.mxu0 %v515_v31  ;;  %v1958_v31 = vld [vmem:[%s1810_s18 + $0x108] sm:$0xff] }
  0x7f   : > { %930 = vmatpush.xpose.msrb.mxu2 %v513_v32  ;;  %995 = vmatpush.xpose.msrb.mxu3 %v514_v33  ;;  %v485_v32 = vld [vmem:[#allocation5 + $0x270] sm:$0xff]  ;;  %v486_v33 = vld [vmem:[#allocation5 + $0x278] sm:$0xff] }
  0x80   : > { %865 = vmatpush.xpose.msrb.mxu1 %v512_v34  ;;  %v483_v34 = vld [vmem:[#allocation5 + $0x260] sm:$0xff] }
  0x81   : > { %800 = vmatpush.xpose.msrb.mxu0 %v511_v35  ;;  %v484_v35 = vld [vmem:[#allocation5 + $0x268] sm:$0xff] }
  0x82   : > { %690 = vmatmul.f32.gmra.mxu2 %v1869_v38  ;;  %755 = vmatmul.f32.gmra.mxu3 %v1872_v39 }
  0x83   : > { %931 = vmatpush.xpose.msrb.mxu2 %v509_v36  ;;  %996 = vmatpush.xpose.msrb.mxu3 %v510_v37  ;;  %v1965_v36 = vld [vmem:[%s1810_s18 + $0x130] sm:$0xff]  ;;  %v1968_v37 = vld [vmem:[%s1810_s18 + $0x138] sm:$0xff] }
  0x84   : > { %560 = vmatmul.f32.gmra.mxu0 %v1875_v40  ;;  %866 = vmatpush.xpose.msrb.mxu1 %v508_v41  ;;  %v1971_v41 = vld [vmem:[%s1810_s18 + $0x120] sm:$0xff] }
  0x85   : > { %625 = vmatmul.f32.gmra.mxu1 %v1878_v42  ;;  %801 = vmatpush.xpose.msrb.mxu0 %v507_v43  ;;  %v1974_v43 = vld [vmem:[%s1810_s18 + $0x128] sm:$0xff] }
  0x87   : > { %932 = vmatpush.xpose.msrb.mxu2 %v505_v44  ;;  %997 = vmatpush.xpose.msrb.mxu3 %v506_v45  ;;  %v481_v44 = vld [vmem:[#allocation5 + $0x250] sm:$0xff]  ;;  %v482_v45 = vld [vmem:[#allocation5 + $0x258] sm:$0xff] }
  0x88   : > { %867 = vmatpush.xpose.msrb.mxu1 %v504_v46  ;;  %v479_v46 = vld [vmem:[#allocation5 + $0x240] sm:$0xff] }
  0x89   : > { %802 = vmatpush.xpose.msrb.mxu0 %v503_v47  ;;  %v480_v47 = vld [vmem:[#allocation5 + $0x248] sm:$0xff] }
  0x8a   : > { %693 = vmatmul.f32.gmra.mxu2 %v1885_v48  ;;  %758 = vmatmul.f32.gmra.mxu3 %v1888_v49 }
  0x8b   : > { %933 = vmatpush.xpose.msrb.mxu2 %v501_v52  ;;  %998 = vmatpush.xpose.msrb.mxu3 %v502_v53  ;;  %v1981_v52 = vld [vmem:[%s1810_s18 + $0x150] sm:$0xff]  ;;  %v1984_v53 = vld [vmem:[%s1810_s18 + $0x158] sm:$0xff] }
  0x8c   : > { %563 = vmatmul.f32.gmra.mxu0 %v1891_v50  ;;  %868 = vmatpush.xpose.msrb.mxu1 %v500_v55  ;;  %v1990_v55 = vld [vmem:[%s1810_s18 + $0x148] sm:$0xff] }
  0x8d   : > { %628 = vmatmul.f32.gmra.mxu1 %v1894_v51  ;;  %803 = vmatpush.xpose.msrb.mxu0 %v499_v54  ;;  %v1987_v54 = vld [vmem:[%s1810_s18 + $0x140] sm:$0xff] }
  0x8f   : > { %934 = vmatpush.xpose.msrb.mxu2 %v497_v60  ;;  %999 = vmatpush.xpose.msrb.mxu3 %v498_v61  ;;  %v477_v60 = vld [vmem:[#allocation5 + $0x230] sm:$0xff]  ;;  %v478_v61 = vld [vmem:[#allocation5 + $0x238] sm:$0xff] }
  0x90   : > { %869 = vmatpush.xpose.msrb.mxu1 %v496_v63  ;;  %v476_v63 = vld [vmem:[#allocation5 + $0x228] sm:$0xff] }
  0x91   : > { %804 = vmatpush.xpose.msrb.mxu0 %v495_v62  ;;  %v475_v62 = vld [vmem:[#allocation5 + $0x220] sm:$0xff] }
  0x92   : > { %696 = vmatmul.f32.gmra.mxu2 %v1901_v56  ;;  %761 = vmatmul.f32.gmra.mxu3 %v1904_v57 }
  0x93   : > { %935 = vmatpush.xpose.msrb.mxu2 %v493_v8  ;;  %1000 = vmatpush.xpose.msrb.mxu3 %v494_v9  ;;  %v1997_v8 = vld [vmem:[%s1810_s18 + $0x170] sm:$0xff]  ;;  %v2000_v9 = vld [vmem:[%s1810_s18 + $0x178] sm:$0xff] }
  0x94   : > { %566 = vmatmul.f32.gmra.mxu0 %v1907_v58  ;;  %870 = vmatpush.xpose.msrb.mxu1 %v492_v11  ;;  %v2006_v11 = vld [vmem:[%s1810_s18 + $0x168] sm:$0xff] }
  0x95   : > { %631 = vmatmul.f32.gmra.mxu1 %v1910_v59  ;;  %805 = vmatpush.xpose.msrb.mxu0 %v491_v10  ;;  %v2003_v10 = vld [vmem:[%s1810_s18 + $0x160] sm:$0xff] }
  0x97   : > { %936 = vmatpush.xpose.msrb.mxu2 %v489_v20  ;;  %1001 = vmatpush.xpose.msrb.mxu3 %v490_v21  ;;  %v473_v20 = vld [vmem:[#allocation5 + $0x210] sm:$0xff]  ;;  %v474_v21 = vld [vmem:[#allocation5 + $0x218] sm:$0xff] }
  0x98   : > { %871 = vmatpush.xpose.msrb.mxu1 %v488_v23  ;;  %v472_v23 = vld [vmem:[#allocation5 + $0x208] sm:$0xff] }
  0x99   : > { %806 = vmatpush.xpose.msrb.mxu0 %v487_v22  ;;  %v471_v22 = vld [vmem:[#allocation5 + $0x200] sm:$0xff] }
  0x9a   : > { %699 = vmatmul.f32.gmra.mxu2 %v1917_v0  ;;  %764 = vmatmul.f32.gmra.mxu3 %v1920_v1 }
  0x9b   : > { %937 = vmatpush.xpose.msrb.mxu2 %v485_v32  ;;  %1002 = vmatpush.xpose.msrb.mxu3 %v486_v33  ;;  %v2013_v32 = vld [vmem:[%s1810_s18 + $0x190] sm:$0xff]  ;;  %v2016_v33 = vld [vmem:[%s1810_s18 + $0x198] sm:$0xff] }
  0x9c   : > { %569 = vmatmul.f32.gmra.mxu0 %v1923_v5  ;;  %872 = vmatpush.xpose.msrb.mxu1 %v484_v35  ;;  %v2022_v35 = vld [vmem:[%s1810_s18 + $0x188] sm:$0xff] }
  0x9d   : > { %634 = vmatmul.f32.gmra.mxu1 %v1926_v7  ;;  %807 = vmatpush.xpose.msrb.mxu0 %v483_v34  ;;  %v2019_v34 = vld [vmem:[%s1810_s18 + $0x180] sm:$0xff] }
  0x9f   : > { %938 = vmatpush.xpose.msrb.mxu2 %v481_v44  ;;  %1003 = vmatpush.xpose.msrb.mxu3 %v482_v45  ;;  %v2029_v44 = vld [vmem:[%s1810_s18 + $0x1b0] sm:$0xff]  ;;  %v2032_v45 = vld [vmem:[%s1810_s18 + $0x1b8] sm:$0xff] }
  0xa0   : > { %873 = vmatpush.xpose.msrb.mxu1 %v480_v47  ;;  %2274 = vst [vmem:[#allocation12_spill] sm:$0xff] %v2032_v45  ;;  %v2038_v47 = vld [vmem:[%s1810_s18 + $0x1a8] sm:$0xff] }
  0xa1   : > { %808 = vmatpush.xpose.msrb.mxu0 %v479_v46  ;;  %v2035_v46 = vld [vmem:[%s1810_s18 + $0x1a0] sm:$0xff]  ;;  %2276 = vst [vmem:[#allocation14_spill] sm:$0xff] %v2038_v47 }
  0xa2   : > { %702 = vmatmul.f32.gmra.mxu2 %v1933_v12  ;;  %767 = vmatmul.f32.gmra.mxu3 %v1936_v13  ;;  %2275 = vst [vmem:[#allocation13_spill] sm:$0xff] %v2035_v46 }
  0xa3   : > { %939 = vmatpush.xpose.msrb.mxu2 %v477_v60  ;;  %1004 = vmatpush.xpose.msrb.mxu3 %v478_v61  ;;  %v2045_v60 = vld [vmem:[%s1810_s18 + $0x1d0] sm:$0xff]  ;;  %v2048_v61 = vld [vmem:[%s1810_s18 + $0x1d8] sm:$0xff] }
  0xa4   : > { %572 = vmatmul.f32.gmra.mxu0 %v1939_v17  ;;  %874 = vmatpush.xpose.msrb.mxu1 %v476_v63  ;;  %2277 = vst [vmem:[#allocation15_spill] sm:$0xff] %v2045_v60  ;;  %v2054_v63 = vld [vmem:[%s1810_s18 + $0x1c8] sm:$0xff] }
  0xa5   : > { %637 = vmatmul.f32.gmra.mxu1 %v1942_v19  ;;  %809 = vmatpush.xpose.msrb.mxu0 %v475_v62  ;;  %2278 = vst [vmem:[#allocation16_spill] sm:$0xff] %v2048_v61  ;;  %v2051_v62 = vld [vmem:[%s1810_s18 + $0x1c0] sm:$0xff] }
  0xa6   : > { %2279 = vst [vmem:[#allocation17_spill] sm:$0xff] %v2051_v62 }
  0xa7   : > { %940 = vmatpush.xpose.msrb.mxu2 %v473_v20  ;;  %1005 = vmatpush.xpose.msrb.mxu3 %v474_v21  ;;  %2280 = vst [vmem:[#allocation18_spill] sm:$0xff] %v2054_v63  ;;  %v2061_v20 = vld [vmem:[%s1810_s18 + $0x1f0] sm:$0xff]  ;;  %v2064_v21 = vld [vmem:[%s1810_s18 + $0x1f8] sm:$0xff] }
  0xa8   : > { %875 = vmatpush.xpose.msrb.mxu1 %v472_v23  ;;  %2281 = vst [vmem:[#allocation19_spill] sm:$0xff] %v2061_v20  ;;  %v2070_v23 = vld [vmem:[%s1810_s18 + $0x1e8] sm:$0xff] }
  0xa9   : > { %810 = vmatpush.xpose.msrb.mxu0 %v471_v22  ;;  %2282 = vst [vmem:[#allocation20_spill] sm:$0xff] %v2064_v21  ;;  %v2067_v22 = vld [vmem:[%s1810_s18 + $0x1e0] sm:$0xff] }
  0xaa   : > { %705 = vmatmul.f32.gmra.mxu2 %v1949_v24  ;;  %770 = vmatmul.f32.gmra.mxu3 %v1952_v25  ;;  %2283 = vst [vmem:[#allocation21_spill] sm:$0xff] %v2067_v22 }
  0xab   : > { %2284 = vst [vmem:[#allocation22_spill] sm:$0xff] %v2070_v23 }
  0xac   : > { %575 = vmatmul.f32.gmra.mxu0 %v1955_v29 }
  0xad   : > { %640 = vmatmul.f32.gmra.mxu1 %v1958_v31 }
  0xb2   : > { %708 = vmatmul.f32.gmra.mxu2 %v1965_v36  ;;  %773 = vmatmul.f32.gmra.mxu3 %v1968_v37 }
  0xb4   : > { %578 = vmatmul.f32.gmra.mxu0 %v1971_v41 }
  0xb5   : > { %643 = vmatmul.f32.gmra.mxu1 %v1974_v43 }
  0xba   : > { %711 = vmatmul.f32.gmra.mxu2 %v1981_v52  ;;  %776 = vmatmul.f32.gmra.mxu3 %v1984_v53 }
  0xbc   : > { %581 = vmatmul.f32.gmra.mxu0 %v1987_v54 }
  0xbd   : > { %646 = vmatmul.f32.gmra.mxu1 %v1990_v55 }
  0xc2   : > { %714 = vmatmul.f32.gmra.mxu2 %v1997_v8  ;;  %779 = vmatmul.f32.gmra.mxu3 %v2000_v9 }
  0xc4   : > { %584 = vmatmul.f32.gmra.mxu0 %v2003_v10 }
  0xc5   : > { %649 = vmatmul.f32.gmra.mxu1 %v2006_v11 }
  0xca   : > { %717 = vmatmul.f32.gmra.mxu2 %v2013_v32  ;;  %782 = vmatmul.f32.gmra.mxu3 %v2016_v33 }
  0xcc   : > { %587 = vmatmul.f32.gmra.mxu0 %v2019_v34 }
  0xcd   : > { %652 = vmatmul.f32.gmra.mxu1 %v2022_v35 }
  0xd2   : > { %720 = vmatmul.f32.gmra.mxu2 %v2029_v44  ;;  %785 = vmatmul.f32.gmra.mxu3 %v2032_v45 }
  0xd4   : > { %590 = vmatmul.f32.gmra.mxu0 %v2035_v46 }
  0xd5   : > { %655 = vmatmul.f32.gmra.mxu1 %v2038_v47 }
  0xda   : > { %723 = vmatmul.f32.gmra.mxu2 %v2045_v60  ;;  %788 = vmatmul.f32.gmra.mxu3 %v2048_v61 }
  0xdc   : > { %593 = vmatmul.f32.gmra.mxu0 %v2051_v62 }
  0xdd   : > { %658 = vmatmul.f32.gmra.mxu1 %v2054_v63 }
  0xe2   : > { %726 = vmatmul.f32.gmra.mxu2 %v2061_v20  ;;  %791 = vmatmul.f32.gmra.mxu3 %v2064_v21  ;;  %v2080_v21 = vld [vmem:[#allocation7] sm:$0x3] }
  0xe4   : > { %596 = vmatmul.f32.gmra.mxu0 %v2067_v22 }
  0xe5   : > { %661 = vmatmul.f32.gmra.mxu1 %v2070_v23  ;;  %v2084_v23 = vperm.slane %v2080_v21, 0 }
  0xe9   : > { %v552_v62 = vpop.f32.mrf.mxu0 }
  0xea   : > { %v617_v61 = vpop.f32.mrf.mxu1  ;;  %941 = vmatmul.f32.vlgmr.msrb.gmra.mxu2 %v1821_v2  ;;  %1006 = vmatmul.f32.vlgmr.msrb.gmra.mxu3 %v1824_v3 }
  0xeb   : > { %v618_v63 = vadd.f32 %v617_v61, %v552_v62 }
  0xec   : > { %811 = vmatmul.f32.vlgmr.msrb.gmra.mxu0 %v1827_v4 }
  0xed   : > { %876 = vmatmul.f32.vlgmr.msrb.gmra.mxu1 %v1830_v6  ;;  %v682_v60 = vpop.f32.mrf.mxu2  ;;  %v747_v20 = vpop.f32.mrf.mxu3 }
  0xee   : > { %v683_v47 = vadd.f32 %v682_v60, %v618_v63 }
  0xf0   : > { %v748_v22 = vadd.f32 %v747_v20, %v683_v47 }
  0xf1   : > { %v555_v46 = vpop.f32.mrf.mxu0 }
  0xf2   : > { %v620_v45 = vpop.f32.mrf.mxu1  ;;  %944 = vmatmul.f32.gmra.mxu2 %v1837_v14  ;;  %1009 = vmatmul.f32.gmra.mxu3 %v1840_v15  ;;  %v1154_v3 = vmul.f32 0.044194173, %v748_v22 }
  0xf3   : > { %v621_v2 = vadd.f32 %v620_v45, %v555_v46 }
  0xf4   : > { %814 = vmatmul.f32.gmra.mxu0 %v1843_v16  ;;  %v1192_v47 = vadd.f32 %v2084_v23, %v1154_v3 }
  0xf5   : > { %879 = vmatmul.f32.gmra.mxu1 %v1846_v18  ;;  %v685_v4 = vpop.f32.mrf.mxu2  ;;  %v750_v6 = vpop.f32.mrf.mxu3 }
  0xf6   : > { %v686_v60 = vadd.f32 %v685_v4, %v621_v2  ;;  %1224 = vst [vmem:[%s2091_s21] sm:$0xff] %v1192_v47 }
  0xf8   : > { %v751_v61 = vadd.f32 %v750_v6, %v686_v60 }
  0xf9   : > { %v558_v14 = vpop.f32.mrf.mxu0 }
  0xfa   : > { %v623_v45 = vpop.f32.mrf.mxu1  ;;  %947 = vmatmul.f32.gmra.mxu2 %v1853_v26  ;;  %1012 = vmatmul.f32.gmra.mxu3 %v1856_v27  ;;  %v1156_v16 = vmul.f32 0.044194173, %v751_v61 }
  0xfb   : > { %v624_v15 = vadd.f32 %v623_v45, %v558_v14 }
  0xfc   : > { %817 = vmatmul.f32.gmra.mxu0 %v1859_v28  ;;  %v1194_v62 = vadd.f32 %v2084_v23, %v1156_v16 }
  0xfd   : > { %882 = vmatmul.f32.gmra.mxu1 %v1862_v30  ;;  %v688_v18 = vpop.f32.mrf.mxu2  ;;  %v753_v46 = vpop.f32.mrf.mxu3 }
  0xfe   : > { %v689_v63 = vadd.f32 %v688_v18, %v624_v15  ;;  %1226 = vst [vmem:[%s2091_s21 + $0x10] sm:$0xff] %v1194_v62 }
 0x100   : > { %v754_v20 = vadd.f32 %v753_v46, %v689_v63 }
 0x101   : > { %v561_v22 = vpop.f32.mrf.mxu0 }
 0x102   : > { %v626_v2 = vpop.f32.mrf.mxu1  ;;  %950 = vmatmul.f32.gmra.mxu2 %v1869_v38  ;;  %1015 = vmatmul.f32.gmra.mxu3 %v1872_v39  ;;  %v1158_v27 = vmul.f32 0.044194173, %v754_v20 }
 0x103   : > { %v627_v26 = vadd.f32 %v626_v2, %v561_v22 }
 0x104   : > { %820 = vmatmul.f32.gmra.mxu0 %v1875_v40  ;;  %v1196_v3 = vadd.f32 %v2084_v23, %v1158_v27 }
 0x105   : > { %885 = vmatmul.f32.gmra.mxu1 %v1878_v42  ;;  %v691_v28 = vpop.f32.mrf.mxu2  ;;  %v756_v30 = vpop.f32.mrf.mxu3 }
 0x106   : > { %v692_v4 = vadd.f32 %v691_v28, %v627_v26  ;;  %1228 = vst [vmem:[%s2091_s21 + $0x20] sm:$0xff] %v1196_v3 }
 0x108   : > { %v757_v6 = vadd.f32 %v756_v30, %v692_v4 }
 0x109   : > { %v564_v47 = vpop.f32.mrf.mxu0 }
 0x10a   : > { %v629_v60 = vpop.f32.mrf.mxu1  ;;  %953 = vmatmul.f32.gmra.mxu2 %v1885_v48  ;;  %1018 = vmatmul.f32.gmra.mxu3 %v1888_v49  ;;  %v1160_v39 = vmul.f32 0.044194173, %v757_v6 }
 0x10b   : > { %v630_v38 = vadd.f32 %v629_v60, %v564_v47 }
 0x10c   : > { %823 = vmatmul.f32.gmra.mxu0 %v1891_v50  ;;  %v1198_v61 = vadd.f32 %v2084_v23, %v1160_v39 }
 0x10d   : > { %888 = vmatmul.f32.gmra.mxu1 %v1894_v51  ;;  %v694_v40 = vpop.f32.mrf.mxu2  ;;  %v759_v42 = vpop.f32.mrf.mxu3 }
 0x10e   : > { %v695_v14 = vadd.f32 %v694_v40, %v630_v38  ;;  %1230 = vst [vmem:[%s2091_s21 + $0x30] sm:$0xff] %v1198_v61 }
 0x110   : > { %v760_v45 = vadd.f32 %v759_v42, %v695_v14 }
 0x111   : > { %v567_v15 = vpop.f32.mrf.mxu0 }
 0x112   : > { %v632_v16 = vpop.f32.mrf.mxu1  ;;  %956 = vmatmul.f32.gmra.mxu2 %v1901_v56  ;;  %1021 = vmatmul.f32.gmra.mxu3 %v1904_v57  ;;  %v1162_v49 = vmul.f32 0.044194173, %v760_v45 }
 0x113   : > { %v633_v48 = vadd.f32 %v632_v16, %v567_v15 }
 0x114   : > { %826 = vmatmul.f32.gmra.mxu0 %v1907_v58  ;;  %v1200_v18 = vadd.f32 %v2084_v23, %v1162_v49 }
 0x115   : > { %891 = vmatmul.f32.gmra.mxu1 %v1910_v59  ;;  %v697_v50 = vpop.f32.mrf.mxu2  ;;  %v762_v51 = vpop.f32.mrf.mxu3 }
 0x116   : > { %v698_v46 = vadd.f32 %v697_v50, %v633_v48  ;;  %1232 = vst [vmem:[%s2091_s21 + $0x40] sm:$0xff] %v1200_v18 }
 0x118   : > { %v763_v62 = vadd.f32 %v762_v51, %v698_v46 }
 0x119   : > { %v570_v63 = vpop.f32.mrf.mxu0 }
 0x11a   : > { %v635_v20 = vpop.f32.mrf.mxu1  ;;  %959 = vmatmul.f32.gmra.mxu2 %v1917_v0  ;;  %1024 = vmatmul.f32.gmra.mxu3 %v1920_v1  ;;  %v1164_v57 = vmul.f32 0.044194173, %v763_v62 }
 0x11b   : > { %v636_v56 = vadd.f32 %v635_v20, %v570_v63 }
 0x11c   : > { %829 = vmatmul.f32.gmra.mxu0 %v1923_v5  ;;  %v1202_v22 = vadd.f32 %v2084_v23, %v1164_v57 }
 0x11d   : > { %894 = vmatmul.f32.gmra.mxu1 %v1926_v7  ;;  %v700_v58 = vpop.f32.mrf.mxu2  ;;  %v765_v59 = vpop.f32.mrf.mxu3 }
 0x11e   : > { %v701_v2 = vadd.f32 %v700_v58, %v636_v56  ;;  %1234 = vst [vmem:[%s2091_s21 + $0x50] sm:$0xff] %v1202_v22 }
 0x120   : > { %v766_v26 = vadd.f32 %v765_v59, %v701_v2 }
 0x121   : > { %v573_v27 = vpop.f32.mrf.mxu0 }
 0x122   : > { %v638_v28 = vpop.f32.mrf.mxu1  ;;  %962 = vmatmul.f32.gmra.mxu2 %v1933_v12  ;;  %1027 = vmatmul.f32.gmra.mxu3 %v1936_v13  ;;  %v1166_v1 = vmul.f32 0.044194173, %v766_v26  ;;  %v2285_v26 = vld [vmem:[#allocation12_spill] sm:$0xff] }
 0x123   : > { %v639_v0 = vadd.f32 %v638_v28, %v573_v27  ;;  %v2287_v27 = vld [vmem:[#allocation14_spill] sm:$0xff] }
 0x124   : > { %832 = vmatmul.f32.gmra.mxu0 %v1939_v17  ;;  %v1204_v30 = vadd.f32 %v2084_v23, %v1166_v1 }
 0x125   : > { %897 = vmatmul.f32.gmra.mxu1 %v1942_v19  ;;  %v703_v5 = vpop.f32.mrf.mxu2  ;;  %v768_v7 = vpop.f32.mrf.mxu3 }
 0x126   : > { %v704_v3 = vadd.f32 %v703_v5, %v639_v0  ;;  %1236 = vst [vmem:[%s2091_s21 + $0x60] sm:$0xff] %v1204_v30 }
 0x128   : > { %v769_v4 = vadd.f32 %v768_v7, %v704_v3  ;;  %v2288_v3 = vld [vmem:[#allocation15_spill] sm:$0xff] }
 0x129   : > { %v576_v6 = vpop.f32.mrf.mxu0 }
 0x12a   : > { %v641_v47 = vpop.f32.mrf.mxu1  ;;  %965 = vmatmul.f32.gmra.mxu2 %v1949_v24  ;;  %1030 = vmatmul.f32.gmra.mxu3 %v1952_v25  ;;  %v1168_v13 = vmul.f32 0.044194173, %v769_v4  ;;  %v2289_v4 = vld [vmem:[#allocation16_spill] sm:$0xff] }
 0x12b   : > { %v642_v12 = vadd.f32 %v641_v47, %v576_v6  ;;  %v2290_v6 = vld [vmem:[#allocation17_spill] sm:$0xff] }
 0x12c   : > { %835 = vmatmul.f32.gmra.mxu0 %v1955_v29  ;;  %v1206_v60 = vadd.f32 %v2084_v23, %v1168_v13 }
 0x12d   : > { %900 = vmatmul.f32.gmra.mxu1 %v1958_v31  ;;  %v706_v17 = vpop.f32.mrf.mxu2  ;;  %v771_v19 = vpop.f32.mrf.mxu3 }
 0x12e   : > { %v707_v38 = vadd.f32 %v706_v17, %v642_v12  ;;  %1238 = vst [vmem:[%s2091_s21 + $0x70] sm:$0xff] %v1206_v60  ;;  %v2291_v12 = vld [vmem:[#allocation18_spill] sm:$0xff] }
 0x130   : > { %v772_v39 = vadd.f32 %v771_v19, %v707_v38 }
 0x131   : > { %v579_v40 = vpop.f32.mrf.mxu0 }
 0x132   : > { %v644_v42 = vpop.f32.mrf.mxu1  ;;  %968 = vmatmul.f32.gmra.mxu2 %v1965_v36  ;;  %1033 = vmatmul.f32.gmra.mxu3 %v1968_v37  ;;  %v1170_v25 = vmul.f32 0.044194173, %v772_v39 }
 0x133   : > { %v645_v24 = vadd.f32 %v644_v42, %v579_v40  ;;  %v2292_v42 = vld [vmem:[#allocation19_spill] sm:$0xff] }
 0x134   : > { %838 = vmatmul.f32.gmra.mxu0 %v1971_v41  ;;  %v1208_v61 = vadd.f32 %v2084_v23, %v1170_v25  ;;  %v2293_v25 = vld [vmem:[#allocation20_spill] sm:$0xff] }
 0x135   : > { %903 = vmatmul.f32.gmra.mxu1 %v1974_v43  ;;  %v709_v29 = vpop.f32.mrf.mxu2  ;;  %v774_v31 = vpop.f32.mrf.mxu3 }
 0x136   : > { %v710_v14 = vadd.f32 %v709_v29, %v645_v24  ;;  %1240 = vst [vmem:[%s2091_s21 + $0x80] sm:$0xff] %v1208_v61  ;;  %v2294_v29 = vld [vmem:[#allocation21_spill] sm:$0xff]  ;;  %v2295_v61 = vld [vmem:[#allocation22_spill] sm:$0xff] }
 0x138   : > { %v775_v45 = vadd.f32 %v774_v31, %v710_v14 }
 0x139   : > { %v582_v15 = vpop.f32.mrf.mxu0 }
 0x13a   : > { %v647_v16 = vpop.f32.mrf.mxu1  ;;  %971 = vmatmul.f32.gmra.mxu2 %v1981_v52  ;;  %1036 = vmatmul.f32.gmra.mxu3 %v1984_v53  ;;  %v1172_v37 = vmul.f32 0.044194173, %v775_v45 }
 0x13b   : > { %v648_v36 = vadd.f32 %v647_v16, %v582_v15 }
 0x13c   : > { %841 = vmatmul.f32.gmra.mxu0 %v1987_v54  ;;  %v1210_v48 = vadd.f32 %v2084_v23, %v1172_v37 }
 0x13d   : > { %906 = vmatmul.f32.gmra.mxu1 %v1990_v55  ;;  %v712_v41 = vpop.f32.mrf.mxu2  ;;  %v777_v43 = vpop.f32.mrf.mxu3 }
 0x13e   : > { %v713_v49 = vadd.f32 %v712_v41, %v648_v36  ;;  %1242 = vst [vmem:[%s2091_s21 + $0x90] sm:$0xff] %v1210_v48 }
 0x140   : > { %v778_v50 = vadd.f32 %v777_v43, %v713_v49 }
 0x141   : > { %v585_v51 = vpop.f32.mrf.mxu0 }
 0x142   : > { %v650_v18 = vpop.f32.mrf.mxu1  ;;  %974 = vmatmul.f32.gmra.mxu2 %v1997_v8  ;;  %1039 = vmatmul.f32.gmra.mxu3 %v2000_v9  ;;  %v1174_v53 = vmul.f32 0.044194173, %v778_v50 }
 0x143   : > { %v651_v52 = vadd.f32 %v650_v18, %v585_v51 }
 0x144   : > { %844 = vmatmul.f32.gmra.mxu0 %v2003_v10  ;;  %v1212_v46 = vadd.f32 %v2084_v23, %v1174_v53 }
 0x145   : > { %909 = vmatmul.f32.gmra.mxu1 %v2006_v11  ;;  %v715_v54 = vpop.f32.mrf.mxu2  ;;  %v780_v55 = vpop.f32.mrf.mxu3 }
 0x146   : > { %v716_v62 = vadd.f32 %v715_v54, %v651_v52  ;;  %1244 = vst [vmem:[%s2091_s21 + $0xa0] sm:$0xff] %v1212_v46 }
 0x148   : > { %v781_v63 = vadd.f32 %v780_v55, %v716_v62  ;;  %v2181_v55 = vperm.slane %v2080_v21, 1 }
 0x149   : > { %v588_v20 = vpop.f32.mrf.mxu0 }
 0x14a   : > { %v653_v56 = vpop.f32.mrf.mxu1  ;;  %977 = vmatmul.f32.gmra.mxu2 %v2013_v32  ;;  %1042 = vmatmul.f32.gmra.mxu3 %v2016_v33  ;;  %v1176_v9 = vmul.f32 0.044194173, %v781_v63  ;;  %v2286_v33 = vld [vmem:[#allocation13_spill] sm:$0xff] }
 0x14b   : > { %v654_v8 = vadd.f32 %v653_v56, %v588_v20 }
 0x14c   : > { %847 = vmatmul.f32.gmra.mxu0 %v2019_v34  ;;  %v1214_v57 = vadd.f32 %v2084_v23, %v1176_v9 }
 0x14d   : > { %912 = vmatmul.f32.gmra.mxu1 %v2022_v35  ;;  %v718_v10 = vpop.f32.mrf.mxu2  ;;  %v783_v11 = vpop.f32.mrf.mxu3 }
 0x14e   : > { %v719_v58 = vadd.f32 %v718_v10, %v654_v8  ;;  %1246 = vst [vmem:[%s2091_s21 + $0xb0] sm:$0xff] %v1214_v57 }
 0x150   : > { %v784_v59 = vadd.f32 %v783_v11, %v719_v58 }
 0x151   : > { %v591_v22 = vpop.f32.mrf.mxu0 }
 0x152   : > { %v656_v2 = vpop.f32.mrf.mxu1  ;;  %980 = vmatmul.f32.gmra.mxu2 %v2029_v44  ;;  %1045 = vmatmul.f32.gmra.mxu3 %v2285_v26  ;;  %v1178_v34 = vmul.f32 0.044194173, %v784_v59 }
 0x153   : > { %v657_v32 = vadd.f32 %v656_v2, %v591_v22 }
 0x154   : > { %850 = vmatmul.f32.gmra.mxu0 %v2286_v33  ;;  %v1216_v0 = vadd.f32 %v2084_v23, %v1178_v34 }
 0x155   : > { %915 = vmatmul.f32.gmra.mxu1 %v2287_v27  ;;  %v721_v35 = vpop.f32.mrf.mxu2  ;;  %v786_v28 = vpop.f32.mrf.mxu3 }
 0x156   : > { %v722_v1 = vadd.f32 %v721_v35, %v657_v32  ;;  %1248 = vst [vmem:[%s2091_s21 + $0xc0] sm:$0xff] %v1216_v0 }
 0x158   : > { %v787_v5 = vadd.f32 %v786_v28, %v722_v1 }
 0x159   : > { %v594_v7 = vpop.f32.mrf.mxu0 }
 0x15a   : > { %v659_v30 = vpop.f32.mrf.mxu1  ;;  %983 = vmatmul.f32.gmra.mxu2 %v2288_v3  ;;  %1048 = vmatmul.f32.gmra.mxu3 %v2289_v4  ;;  %v1180_v47 = vmul.f32 0.044194173, %v787_v5 }
 0x15b   : > { %v660_v44 = vadd.f32 %v659_v30, %v594_v7 }
 0x15c   : > { %853 = vmatmul.f32.gmra.mxu0 %v2290_v6  ;;  %v1218_v19 = vadd.f32 %v2084_v23, %v1180_v47 }
 0x15d   : > { %918 = vmatmul.f32.gmra.mxu1 %v2291_v12  ;;  %v724_v13 = vpop.f32.mrf.mxu2  ;;  %v789_v17 = vpop.f32.mrf.mxu3 }
 0x15e   : > { %v725_v60 = vadd.f32 %v724_v13, %v660_v44  ;;  %1250 = vst [vmem:[%s2091_s21 + $0xd0] sm:$0xff] %v1218_v19 }
 0x160   : > { %v790_v38 = vadd.f32 %v789_v17, %v725_v60 }
 0x161   : > { %v597_v39 = vpop.f32.mrf.mxu0 }
 0x162   : > { %v662_v40 = vpop.f32.mrf.mxu1  ;;  %986 = vmatmul.f32.gmra.mxu2 %v2292_v42  ;;  %1051 = vmatmul.f32.gmra.mxu3 %v2293_v25  ;;  %v1182_v31 = vmul.f32 0.044194173, %v790_v38 }
 0x163   : > { %v663_v24 = vadd.f32 %v662_v40, %v597_v39 }
 0x164   : > { %856 = vmatmul.f32.gmra.mxu0 %v2294_v29  ;;  %v1220_v15 = vadd.f32 %v2084_v23, %v1182_v31 }
 0x165   : > { %921 = vmatmul.f32.gmra.mxu1 %v2295_v61  ;;  %v727_v14 = vpop.f32.mrf.mxu2  ;;  %v792_v45 = vpop.f32.mrf.mxu3 }
 0x166   : > { %v728_v16 = vadd.f32 %v727_v14, %v663_v24  ;;  %1252 = vst [vmem:[%s2091_s21 + $0xe0] sm:$0xff] %v1220_v15 }
 0x168   : > { %v793_v36 = vadd.f32 %v792_v45, %v728_v16 }
 0x169   : > { %v812_v37 = vpop.f32.mrf.mxu0 }
 0x16a   : > { %v877_v41 = vpop.f32.mrf.mxu1  ;;  %v1184_v48 = vmul.f32 0.044194173, %v793_v36 }
 0x16b   : > { %v878_v43 = vadd.f32 %v877_v41, %v812_v37 }
 0x16c   : > { %v1222_v51 = vadd.f32 %v2084_v23, %v1184_v48 }
 0x16d   : > { %v942_v49 = vpop.f32.mrf.mxu2  ;;  %v1007_v50 = vpop.f32.mrf.mxu3 }
 0x16e   : > { %v943_v18 = vadd.f32 %v942_v49, %v878_v43  ;;  %1254 = vst [vmem:[%s2091_s21 + $0xf0] sm:$0xff] %v1222_v51 }
 0x170   : > { %v1008_v52 = vadd.f32 %v1007_v50, %v943_v18 }
 0x171   : > { %v815_v53 = vpop.f32.mrf.mxu0 }
 0x172   : > { %v880_v54 = vpop.f32.mrf.mxu1  ;;  %v1155_v62 = vmul.f32 0.044194173, %v1008_v52 }
 0x173   : > { %v881_v46 = vadd.f32 %v880_v54, %v815_v53 }
 0x174   : > { %v1193_v56 = vadd.f32 %v2181_v55, %v1155_v62 }
 0x175   : > { %v945_v63 = vpop.f32.mrf.mxu2  ;;  %v1010_v20 = vpop.f32.mrf.mxu3 }
 0x176   : > { %v946_v8 = vadd.f32 %v945_v63, %v881_v46  ;;  %1225 = vst [vmem:[%s2091_s21 + $0x8] sm:$0xff] %v1193_v56 }
 0x178   : > { %v1011_v9 = vadd.f32 %v1010_v20, %v946_v8 }
 0x179   : > { %v818_v10 = vpop.f32.mrf.mxu0 }
 0x17a   : > { %v883_v23 = vpop.f32.mrf.mxu1  ;;  %v1157_v57 = vmul.f32 0.044194173, %v1011_v9 }
 0x17b   : > { %v884_v11 = vadd.f32 %v883_v23, %v818_v10 }
 0x17c   : > { %v1195_v21 = vadd.f32 %v2181_v55, %v1157_v57 }
 0x17d   : > { %v948_v58 = vpop.f32.mrf.mxu2  ;;  %v1013_v59 = vpop.f32.mrf.mxu3 }
 0x17e   : > { %v949_v22 = vadd.f32 %v948_v58, %v884_v11  ;;  %1227 = vst [vmem:[%s2091_s21 + $0x18] sm:$0xff] %v1195_v21 }
 0x180   : > { %v1014_v2 = vadd.f32 %v1013_v59, %v949_v22 }
 0x181   : > { %v821_v32 = vpop.f32.mrf.mxu0 }
 0x182   : > { %v886_v26 = vpop.f32.mrf.mxu1  ;;  %v1159_v34 = vmul.f32 0.044194173, %v1014_v2 }
 0x183   : > { %v887_v33 = vadd.f32 %v886_v26, %v821_v32 }
 0x184   : > { %v1197_v28 = vadd.f32 %v2181_v55, %v1159_v34 }
 0x185   : > { %v951_v27 = vpop.f32.mrf.mxu2  ;;  %v1016_v35 = vpop.f32.mrf.mxu3 }
 0x186   : > { %v952_v0 = vadd.f32 %v951_v27, %v887_v33  ;;  %1229 = vst [vmem:[%s2091_s21 + $0x28] sm:$0xff] %v1197_v28 }
 0x188   : > { %v1017_v1 = vadd.f32 %v1016_v35, %v952_v0 }
 0x189   : > { %v824_v5 = vpop.f32.mrf.mxu0 }
 0x18a   : > { %v889_v7 = vpop.f32.mrf.mxu1  ;;  %v1161_v3 = vmul.f32 0.044194173, %v1017_v1 }
 0x18b   : > { %v890_v30 = vadd.f32 %v889_v7, %v824_v5 }
 0x18c   : > { %v1199_v6 = vadd.f32 %v2181_v55, %v1161_v3 }
 0x18d   : > { %v954_v44 = vpop.f32.mrf.mxu2  ;;  %v1019_v4 = vpop.f32.mrf.mxu3 }
 0x18e   : > { %v955_v47 = vadd.f32 %v954_v44, %v890_v30  ;;  %1231 = vst [vmem:[%s2091_s21 + $0x38] sm:$0xff] %v1199_v6 }
 0x190   : > { %v1020_v12 = vadd.f32 %v1019_v4, %v955_v47 }
 0x191   : > { %v827_v13 = vpop.f32.mrf.mxu0 }
 0x192   : > { %v892_v17 = vpop.f32.mrf.mxu1  ;;  %v1163_v60 = vmul.f32 0.044194173, %v1020_v12 }
 0x193   : > { %v893_v19 = vadd.f32 %v892_v17, %v827_v13 }
 0x194   : > { %v1201_v40 = vadd.f32 %v2181_v55, %v1163_v60 }
 0x195   : > { %v957_v38 = vpop.f32.mrf.mxu2  ;;  %v1022_v39 = vpop.f32.mrf.mxu3 }
 0x196   : > { %v958_v42 = vadd.f32 %v957_v38, %v893_v19  ;;  %1233 = vst [vmem:[%s2091_s21 + $0x48] sm:$0xff] %v1201_v40 }
 0x198   : > { %v1023_v24 = vadd.f32 %v1022_v39, %v958_v42 }
 0x199   : > { %v830_v25 = vpop.f32.mrf.mxu0 }
 0x19a   : > { %v895_v29 = vpop.f32.mrf.mxu1  ;;  %v1165_v61 = vmul.f32 0.044194173, %v1023_v24 }
 0x19b   : > { %v896_v31 = vadd.f32 %v895_v29, %v830_v25 }
 0x19c   : > { %v1203_v15 = vadd.f32 %v2181_v55, %v1165_v61 }
 0x19d   : > { %v960_v14 = vpop.f32.mrf.mxu2  ;;  %v1025_v45 = vpop.f32.mrf.mxu3 }
 0x19e   : > { %v961_v16 = vadd.f32 %v960_v14, %v896_v31  ;;  %1235 = vst [vmem:[%s2091_s21 + $0x58] sm:$0xff] %v1203_v15 }
 0x1a0   : > { %v1026_v36 = vadd.f32 %v1025_v45, %v961_v16 }
 0x1a1   : > { %v833_v37 = vpop.f32.mrf.mxu0 }
 0x1a2   : > { %v898_v41 = vpop.f32.mrf.mxu1  ;;  %v1167_v48 = vmul.f32 0.044194173, %v1026_v36 }
 0x1a3   : > { %v899_v43 = vadd.f32 %v898_v41, %v833_v37 }
 0x1a4   : > { %v1205_v51 = vadd.f32 %v2181_v55, %v1167_v48 }
 0x1a5   : > { %v963_v49 = vpop.f32.mrf.mxu2  ;;  %v1028_v50 = vpop.f32.mrf.mxu3 }
 0x1a6   : > { %v964_v18 = vadd.f32 %v963_v49, %v899_v43  ;;  %1237 = vst [vmem:[%s2091_s21 + $0x68] sm:$0xff] %v1205_v51 }
 0x1a8   : > { %v1029_v52 = vadd.f32 %v1028_v50, %v964_v18 }
 0x1a9   : > { %v836_v53 = vpop.f32.mrf.mxu0 }
 0x1aa   : > { %v901_v54 = vpop.f32.mrf.mxu1  ;;  %v1169_v62 = vmul.f32 0.044194173, %v1029_v52 }
 0x1ab   : > { %v902_v46 = vadd.f32 %v901_v54, %v836_v53 }
 0x1ac   : > { %v1207_v56 = vadd.f32 %v2181_v55, %v1169_v62 }
 0x1ad   : > { %v966_v63 = vpop.f32.mrf.mxu2  ;;  %v1031_v20 = vpop.f32.mrf.mxu3 }
 0x1ae   : > { %v967_v8 = vadd.f32 %v966_v63, %v902_v46  ;;  %1239 = vst [vmem:[%s2091_s21 + $0x78] sm:$0xff] %v1207_v56 }
 0x1b0   : > { %v1032_v9 = vadd.f32 %v1031_v20, %v967_v8 }
 0x1b1   : > { %v839_v10 = vpop.f32.mrf.mxu0 }
 0x1b2   : > { %v904_v23 = vpop.f32.mrf.mxu1  ;;  %v1171_v57 = vmul.f32 0.044194173, %v1032_v9 }
 0x1b3   : > { %v905_v11 = vadd.f32 %v904_v23, %v839_v10 }
 0x1b4   : > { %v1209_v21 = vadd.f32 %v2181_v55, %v1171_v57 }
 0x1b5   : > { %v969_v58 = vpop.f32.mrf.mxu2  ;;  %v1034_v59 = vpop.f32.mrf.mxu3 }
 0x1b6   : > { %v970_v22 = vadd.f32 %v969_v58, %v905_v11  ;;  %1241 = vst [vmem:[%s2091_s21 + $0x88] sm:$0xff] %v1209_v21 }
 0x1b8   : > { %v1035_v2 = vadd.f32 %v1034_v59, %v970_v22 }
 0x1b9   : > { %v842_v32 = vpop.f32.mrf.mxu0 }
 0x1ba   : > { %v907_v26 = vpop.f32.mrf.mxu1  ;;  %v1173_v34 = vmul.f32 0.044194173, %v1035_v2 }
 0x1bb   : > { %v908_v33 = vadd.f32 %v907_v26, %v842_v32 }
 0x1bc   : > { %v1211_v28 = vadd.f32 %v2181_v55, %v1173_v34 }
 0x1bd   : > { %v972_v27 = vpop.f32.mrf.mxu2  ;;  %v1037_v35 = vpop.f32.mrf.mxu3 }
 0x1be   : > { %v973_v0 = vadd.f32 %v972_v27, %v908_v33  ;;  %1243 = vst [vmem:[%s2091_s21 + $0x98] sm:$0xff] %v1211_v28 }
 0x1c0   : > { %v1038_v1 = vadd.f32 %v1037_v35, %v973_v0 }
 0x1c1   : > { %v845_v5 = vpop.f32.mrf.mxu0 }
 0x1c2   : > { %v910_v7 = vpop.f32.mrf.mxu1  ;;  %v1175_v3 = vmul.f32 0.044194173, %v1038_v1 }
 0x1c3   : > { %v911_v30 = vadd.f32 %v910_v7, %v845_v5 }
 0x1c4   : > { %v1213_v6 = vadd.f32 %v2181_v55, %v1175_v3 }
 0x1c5   : > { %v975_v44 = vpop.f32.mrf.mxu2  ;;  %v1040_v4 = vpop.f32.mrf.mxu3 }
 0x1c6   : > { %v976_v47 = vadd.f32 %v975_v44, %v911_v30  ;;  %1245 = vst [vmem:[%s2091_s21 + $0xa8] sm:$0xff] %v1213_v6 }
 0x1c8   : > { %v1041_v12 = vadd.f32 %v1040_v4, %v976_v47 }
 0x1c9   : > { %v848_v13 = vpop.f32.mrf.mxu0 }
 0x1ca   : > { %v913_v17 = vpop.f32.mrf.mxu1  ;;  %v1177_v60 = vmul.f32 0.044194173, %v1041_v12 }
 0x1cb   : > { %v914_v19 = vadd.f32 %v913_v17, %v848_v13 }
 0x1cc   : > { %v1215_v40 = vadd.f32 %v2181_v55, %v1177_v60 }
 0x1cd   : > { %v978_v38 = vpop.f32.mrf.mxu2  ;;  %v1043_v39 = vpop.f32.mrf.mxu3 }
 0x1ce   : > { %v979_v42 = vadd.f32 %v978_v38, %v914_v19  ;;  %1247 = vst [vmem:[%s2091_s21 + $0xb8] sm:$0xff] %v1215_v40 }
 0x1d0   : > { %v1044_v24 = vadd.f32 %v1043_v39, %v979_v42 }
 0x1d1   : > { %v851_v25 = vpop.f32.mrf.mxu0 }
 0x1d2   : > { %v916_v29 = vpop.f32.mrf.mxu1  ;;  %v1179_v61 = vmul.f32 0.044194173, %v1044_v24 }
 0x1d3   : > { %v917_v31 = vadd.f32 %v916_v29, %v851_v25 }
 0x1d4   : > { %v1217_v15 = vadd.f32 %v2181_v55, %v1179_v61 }
 0x1d5   : > { %v981_v14 = vpop.f32.mrf.mxu2  ;;  %v1046_v45 = vpop.f32.mrf.mxu3 }
 0x1d6   : > { %v982_v16 = vadd.f32 %v981_v14, %v917_v31  ;;  %1249 = vst [vmem:[%s2091_s21 + $0xc8] sm:$0xff] %v1217_v15 }
 0x1d8   : > { %v1047_v36 = vadd.f32 %v1046_v45, %v982_v16 }
 0x1d9   : > { %v854_v37 = vpop.f32.mrf.mxu0 }
 0x1da   : > { %v919_v41 = vpop.f32.mrf.mxu1  ;;  %v1181_v48 = vmul.f32 0.044194173, %v1047_v36 }
 0x1db   : > { %v920_v43 = vadd.f32 %v919_v41, %v854_v37 }
 0x1dc   : > { %v1219_v51 = vadd.f32 %v2181_v55, %v1181_v48 }
 0x1dd   : > { %v984_v49 = vpop.f32.mrf.mxu2  ;;  %v1049_v50 = vpop.f32.mrf.mxu3 }
 0x1de   : > { %v985_v18 = vadd.f32 %v984_v49, %v920_v43  ;;  %1251 = vst [vmem:[%s2091_s21 + $0xd8] sm:$0xff] %v1219_v51 }
 0x1e0   : > { %v1050_v52 = vadd.f32 %v1049_v50, %v985_v18 }
 0x1e1   : > { %v857_v53 = vpop.f32.mrf.mxu0 }
 0x1e2   : > { %v922_v54 = vpop.f32.mrf.mxu1  ;;  %v1183_v62 = vmul.f32 0.044194173, %v1050_v52 }
 0x1e3   : > { %v923_v46 = vadd.f32 %v922_v54, %v857_v53 }
 0x1e4   : > { %v1221_v56 = vadd.f32 %v2181_v55, %v1183_v62 }
 0x1e5   : > { %v987_v63 = vpop.f32.mrf.mxu2  ;;  %v1052_v20 = vpop.f32.mrf.mxu3 }
 0x1e6   : > { %v988_v8 = vadd.f32 %v987_v63, %v923_v46  ;;  %1253 = vst [vmem:[%s2091_s21 + $0xe8] sm:$0xff] %v1221_v56 }
 0x1e8   : > { %v1053_v9 = vadd.f32 %v1052_v20, %v988_v8 }
 0x1ea   : > { %v1185_v10 = vmul.f32 0.044194173, %v1053_v9 }
 0x1ec   : > { %v1223_v23 = vadd.f32 %v2181_v55, %v1185_v10 }
 0x1ee   : > { %1255 = vst [vmem:[%s2091_s21 + $0xf8] sm:$0xff] %v1223_v23 }
 0x1ef   : > { %1621 = shalt.err (!%p1618_p0)
}
 0x1f0   : > { %s1686_s10 = smov 256   ;;  %s1687_s18 = smov 16  }
 0x1f1   : > { %1426 = dma.vmem_to_hbm [thread:$0]  (%p1783_p2), %s1273_s27, 4096, %s1275_s28, %s1257_s15, %s1686_s10, %s1686_s10, %s1687_s18  }
 0x1f2 PF: > { %s1289_s20 = sand.u32 1, %s1660_s12   ;;  %p1440_p4 = pnand %p1396_p10, %p1753_p5 }
 0x1f3   : > { %s1290_s21 = scalar_lea.sflag [#allocation4], %s1289_s20 }
 0x1f4   : > { %p1441_p6 = pneg %p1440_p4 }
 0x1f6   : > { %1655 = dma.done.wait (%p1441_p6), %s1290_s21, 4096  }
 0x1f7   : > { %1657 = vsyncadd (%p1441_p6), %s1290_s21, 4294963200  ;;  %s20_s17 = sadd.s32 1, %s1680_s17   ;;  %s2296_s12 = smov %s1664_s13 }
 0x1f8   : > { %p17_p8 = scmp.ge.s32.totalorder %s20_s17, 4   ;;  %s2297_s13 = smov %s1668_s14 }
 0x1f9   : > { %s2298_s14 = smov %s1793_s25  ;;  %s2299_s15 = smov %s1676_s16 }
 0x1fa   : > { %s2300_s16 = smov %s2302_s9  ;;  %19 = sbr.rel (!%p17_p8) target bundleno = 7 (0x7), region = 95 }
 0x1ff   :  { %1296 = vsyncpa [#allocation3], 1 }
 0x200   :  { %1298 = vsyncpa [#allocation3 + $0x1], 1 }
 0x201   :  { %1299 = vsyncpa [#allocation6], 1 }
 0x202   :  { %1300 = vsyncpa [#allocation4], 1 }
 0x203   :  { %1302 = vsyncpa [#allocation4 + $0x1], 1 }

</bundles_post_ra>
